<compile_context>
chip_gen: v6e
topology: v6e:2x2x1
jax: 0.10.0
libtpu: 0.0.40
codegen_flags: <defaults>
</compile_context>

<pallas_src>
import jax
import jax.numpy as jnp
from jax.experimental import pallas as pl
from jax.experimental.pallas import tpu as pltpu

NEG_SLOPE = 0.01  # LeakyReLU default slope (FDEmbedding activation)


def _leaky_relu(x):
    return jnp.where(x >= 0, x, NEG_SLOPE * x)


def _cdiv(a, b):
    return (a + b - 1) // b


def _round_up(x, m):
    return (x + m - 1) // m * m


def streaknet_kernel(
    sig_ref,    # (TB, F)    bf16  signal FD features
    tem_ref,    # (TB, F)    bf16  template FD features
    w_emb_ref,  # (2, F, D)  bf16  FDEmbedding weights [w_sig ; w_tem]
    b_emb_ref,  # (2, 1, D)  f32
    w_qkv_ref,  # (D, 3*Dq)  bf16  fused Q|K|V, each segment padded to Dq lanes
    b_qkv_ref,  # (1, 3*Dq)  f32
    w_o_ref,    # (Dq, D)    bf16  attention output projection (rows D: zero)
    b_o_ref,    # (1, D)     f32
    w_h1_ref,   # (2, D, H)  bf16  ImagingHead fc1, split over the two tokens
    b_h1_ref,   # (1, H)     f32
    w_h2_ref,   # (H, Cp)    bf16  ImagingHead fc2, zero-padded to Cp lanes
    b_h2_ref,   # (1, Cp)    f32
    out_ref,    # (TB, C)    f32   logits (narrow, C columns only)
):
    f32 = jnp.float32
    bf16 = jnp.bfloat16
    tb = sig_ref.shape[0]
    dq = w_o_ref.shape[0]      # lane-aligned per-head width (128)
    d = w_o_ref.shape[1]       # true embedding dim
    c = out_ref.shape[1]

    # ---- FDEmbedding: per-branch linear + LeakyReLU -> two tokens ----
    e_sig = _leaky_relu(
        jnp.dot(sig_ref[...], w_emb_ref[0], preferred_element_type=f32) + b_emb_ref[0])
    e_tem = _leaky_relu(
        jnp.dot(tem_ref[...], w_emb_ref[1], preferred_element_type=f32) + b_emb_ref[1])

    # stack the 2-token sequence along sublanes: rows [0:tb]=signal, [tb:2tb]=template
    x = jnp.concatenate([e_sig, e_tem], axis=0)                      # (2TB, D) f32

    # ---- SelfAttention backbone: fused, lane-aligned QKV projection ----
    qkv = (jnp.dot(x.astype(bf16), w_qkv_ref[...], preferred_element_type=f32)
           + b_qkv_ref[...])                                         # (2TB, 3*Dq)
    q = qkv[:, :dq]            # vreg-aligned 128-lane views (padded cols are zero)
    k = qkv[:, dq:2 * dq]
    v = qkv[:, 2 * dq:]

    # swap token halves (sig <-> tem) with a single XLU sublane rotate
    k_sw = pltpu.roll(k, shift=tb, axis=0)
    v_sw = pltpu.roll(v, shift=tb, axis=0)

    scale = 1.0 / jnp.sqrt(jnp.float32(d))
    s_same = jnp.sum(q * k, axis=-1, keepdims=True) * scale          # [s11 ; s22]
    s_cross = jnp.sum(q * k_sw, axis=-1, keepdims=True) * scale      # [s12 ; s21]

    m = jnp.maximum(s_same, s_cross)
    e_same = jnp.exp(s_same - m)
    e_cross = jnp.exp(s_cross - m)
    inv = pl.reciprocal(e_same + e_cross, approx=True)               # EUP slot
    att = (e_same * inv) * v + (e_cross * inv) * v_sw                # (2TB, Dq)

    # output projection + residual (padded rows of w_o are zero -> exact)
    y = (x + jnp.dot(att.astype(bf16), w_o_ref[...], preferred_element_type=f32)
         + b_o_ref[...])                                             # (2TB, D)

    # ---- ImagingHead: [y_s || y_t] @ W1 -> ReLU -> W2 ----
    y_s = y[:tb]
    y_t = y[tb:]
    h = (jnp.dot(y_s.astype(bf16), w_h1_ref[0], preferred_element_type=f32)
         + jnp.dot(y_t.astype(bf16), w_h1_ref[1], preferred_element_type=f32)
         + b_h1_ref[...])
    h = jnp.maximum(h, 0.0)
    logits = (jnp.dot(h.astype(bf16), w_h2_ref[...], preferred_element_type=f32)
              + b_h2_ref[...])                                       # (TB, Cp)
    # narrow store: only the C real logit columns are written back to HBM
    out_ref[...] = logits[:, :c].astype(out_ref.dtype)


def fd_features(x):
    """FDEmbedding preprocessing: rfft then real||imag concat. Plain-JAX glue."""
    xf = jnp.fft.rfft(x.astype(jnp.float32), axis=-1)
    return jnp.concatenate([jnp.real(xf), jnp.imag(xf)], axis=-1).astype(jnp.float32)


def make_params(key, F, D, H, C):
    ks = jax.random.split(key, 12)

    def lin(k, fan_in, shape):
        return jax.random.normal(k, shape, jnp.float32) / jnp.sqrt(jnp.float32(fan_in))

    return {
        "w_sig": lin(ks[0], F, (F, D)), "b_sig": jnp.zeros((1, D), jnp.float32),
        "w_tem": lin(ks[1], F, (F, D)), "b_tem": jnp.zeros((1, D), jnp.float32),
        "wq": lin(ks[2], D, (D, D)), "bq": jnp.zeros((1, D), jnp.float32),
        "wk": lin(ks[3], D, (D, D)), "bk": jnp.zeros((1, D), jnp.float32),
        "wv": lin(ks[4], D, (D, D)), "bv": jnp.zeros((1, D), jnp.float32),
        "wo": lin(ks[5], D, (D, D)), "bo": jnp.zeros((1, D), jnp.float32),
        "wh1a": lin(ks[6], 2 * D, (D, H)),
        "wh1b": lin(ks[7], 2 * D, (D, H)),
        "bh1": jnp.zeros((1, H), jnp.float32),
        "wh2": lin(ks[8], H, (H, C)), "bh2": jnp.zeros((1, C), jnp.float32),
    }


def streaknet_forward(signal, template, params, *, tile_b=1024):
    bf16 = jnp.bfloat16
    sig_f = fd_features(signal)      # (B, F) f32
    tem_f = fd_features(template)    # (B, F) f32
    B, F = sig_f.shape
    D = params["wq"].shape[0]
    H = params["wh1a"].shape[1]
    C = params["wh2"].shape[1]

    Dq = _round_up(max(D, 128), 128)     # lane-aligned Q/K/V segment width
    Cp = _round_up(max(C, 128), 128)     # lane-aligned fc2 width (in-kernel only)

    # ---- batch tiling ----
    # * multiple of 16 (bf16 sublane packing)
    # * capped at ~B/2 so the "parallel" axis has >=2 steps (v7x dual TC)
    # * re-balanced to minimize batch padding
    tile = min(tile_b, _round_up(_cdiv(B, 2), 16))
    tile = max(16, _round_up(tile, 16))
    steps = _cdiv(B, tile)
    tile = _round_up(_cdiv(B, steps), 16)
    B_pad = steps * tile

    # features: unpadded F, zero-filled batch padding, bf16 in HBM
    pad_b = B_pad - B
    sig_p = jnp.pad(sig_f, ((0, pad_b), (0, 0))).astype(bf16)        # (B_pad, F)
    tem_p = jnp.pad(tem_f, ((0, pad_b), (0, 0))).astype(bf16)

    # ---- pack the 17 parameter tensors into 10 slabs (bf16 matmul weights) ----
    def pad_cols(w, n):
        return jnp.pad(w, ((0, 0), (0, n - w.shape[1])))

    w_emb = jnp.stack([params["w_sig"], params["w_tem"]], 0).astype(bf16)   # (2, F, D)
    b_emb = jnp.stack([params["b_sig"], params["b_tem"]], 0)                # (2, 1, D)
    w_qkv = jnp.concatenate(
        [pad_cols(params["wq"], Dq), pad_cols(params["wk"], Dq),
         pad_cols(params["wv"], Dq)], axis=1).astype(bf16)                  # (D, 3*Dq)
    b_qkv = jnp.concatenate(
        [pad_cols(params["bq"], Dq), pad_cols(params["bk"], Dq),
         pad_cols(params["bv"], Dq)], axis=1)                               # (1, 3*Dq)
    w_o = jnp.pad(params["wo"], ((0, Dq - D), (0, 0))).astype(bf16)         # (Dq, D)
    b_o = params["bo"]                                                      # (1, D)
    w_h1 = jnp.stack([params["wh1a"], params["wh1b"]], 0).astype(bf16)      # (2, D, H)
    b_h1 = params["bh1"]                                                    # (1, H)
    w_h2 = jnp.pad(params["wh2"], ((0, 0), (0, Cp - C))).astype(bf16)       # (H, Cp)
    b_h2 = jnp.pad(params["bh2"], ((0, 0), (0, Cp - C)))                    # (1, Cp)

    w_args = [w_emb, b_emb, w_qkv, b_qkv, w_o, b_o, w_h1, b_h1, w_h2, b_h2]

    feat_spec = pl.BlockSpec((tile, F), lambda i: (i, 0))
    out_spec = pl.BlockSpec((tile, C), lambda i: (i, 0))

    def const_spec(arr):
        shp = arr.shape
        return pl.BlockSpec(shp, lambda i: tuple(0 for _ in shp))

    # advisory cost estimate so XLA can overlap the rfft glue with the kernel
    flops = B_pad * (4 * F * D + 12 * D * Dq + 4 * Dq * D + 4 * D * H + 2 * H * Cp)
    bytes_accessed = (
        int(sig_p.size) * sig_p.dtype.itemsize
        + int(tem_p.size) * tem_p.dtype.itemsize
        + B_pad * C * 4
        + sum(int(a.size) * a.dtype.itemsize for a in w_args))
    ce = pl.CostEstimate(flops=flops, transcendentals=6 * B_pad,
                         bytes_accessed=bytes_accessed)

    out = pl.pallas_call(
        streaknet_kernel,
        out_shape=jax.ShapeDtypeStruct((B_pad, C), jnp.float32),
        grid=(steps,),
        in_specs=[feat_spec, feat_spec] + [const_spec(a) for a in w_args],
        out_specs=out_spec,
        compiler_params=pltpu.CompilerParams(
            dimension_semantics=("parallel",),
            vmem_limit_bytes=48 * 1024 * 1024),
        cost_estimate=ce,
    )(sig_p, tem_p, *w_args)
    return out[:B]


def streaknet_reference(signal, template, params):
    """Pure-JAX (f32) reference of the same forward, for correctness checking."""
    sig = fd_features(signal)
    tem = fd_features(template)
    lrelu = lambda x: jnp.where(x >= 0, x, NEG_SLOPE * x)
    e_s = lrelu(sig @ params["w_sig"] + params["b_sig"])
    e_t = lrelu(tem @ params["w_tem"] + params["b_tem"])
    x = jnp.stack([e_s, e_t], axis=1)                       # (B, 2, D)
    q = x @ params["wq"] + params["bq"]
    k = x @ params["wk"] + params["bk"]
    v = x @ params["wv"] + params["bv"]
    s = jnp.einsum("bqd,bkd->bqk", q, k) / jnp.sqrt(jnp.float32(q.shape[-1]))
    a = jax.nn.softmax(s, axis=-1)
    att = jnp.einsum("bqk,bkd->bqd", a, v)
    y = x + att @ params["wo"] + params["bo"]               # (B, 2, D)
    flat = y.reshape(y.shape[0], -1)                        # (B, 2D)
    w1 = jnp.concatenate([params["wh1a"], params["wh1b"]], axis=0)
    h = jnp.maximum(flat @ w1 + params["bh1"], 0.0)
    return h @ params["wh2"] + params["bh2"]


if __name__ == "__main__":
    # Small demo shapes: B pixels, L samples per streak-tube signal.
    # B=24 -> tile=16, grid=2: exercises batch padding and a multi-step run.
    B, L = 24, 64
    D, H, C = 32, 64, 2

    key = jax.random.PRNGKey(0)
    k_sig, k_tem, k_par = jax.random.split(key, 3)
    signal = jax.random.normal(k_sig, (B, L), jnp.float32)
    template = jax.random.normal(k_tem, (B, L), jnp.float32)

    F = 2 * (L // 2 + 1)
    params = make_params(k_par, F, D, H, C)

    out = streaknet_forward(signal, template, params)
    out = jax.block_until_ready(out)

    ref = streaknet_reference(signal, template, params)
    assert out.shape == (B, C), out.shape
    assert bool(jnp.all(jnp.isfinite(out)))
    # bf16 operands (MXU-native) + pl.reciprocal(approx=True) introduce ~1%-level
    # relative error vs the f32 reference; compare with a relative max-error bound.
    err = float(jnp.max(jnp.abs(out - ref)) / (jnp.max(jnp.abs(ref)) + 1e-6))
    assert err < 5e-2, f"mismatch vs JAX reference: rel err {err}"

    # TODO(synk): training branch (head(outs, labels=targets) with cross-entropy loss)
    # is not implemented; only the eval forward path is kernelized.
    print("KERNEL_OK")
</pallas_src>

<mosaic_0001>
module attributes {stable_mosaic.version = 11 : i64} {
  func.func @streaknet_kernel(%arg0: i32, %arg1: memref<16x66xbf16, #tpu.memory_space<vmem>>, %arg2: memref<16x66xbf16, #tpu.memory_space<vmem>>, %arg3: memref<2x66x32xbf16, #tpu.memory_space<vmem>>, %arg4: memref<2x1x32xf32, #tpu.memory_space<vmem>>, %arg5: memref<32x384xbf16, #tpu.memory_space<vmem>>, %arg6: memref<1x384xf32, #tpu.memory_space<vmem>>, %arg7: memref<128x32xbf16, #tpu.memory_space<vmem>>, %arg8: memref<1x32xf32, #tpu.memory_space<vmem>>, %arg9: memref<2x32x64xbf16, #tpu.memory_space<vmem>>, %arg10: memref<1x64xf32, #tpu.memory_space<vmem>>, %arg11: memref<64x128xbf16, #tpu.memory_space<vmem>>, %arg12: memref<1x128xf32, #tpu.memory_space<vmem>>, %arg13: memref<16x2xf32, #tpu.memory_space<vmem>>) attributes {dimension_semantics = [#tpu.dimension_semantics<parallel>], iteration_bounds = array<i64: 2>, scalar_prefetch = 0 : i64, scratch_operands = 0 : i64, tpu.core_type = #tpu.core_type<tc>, window_params = [{transform_indices = @transform_0, window_bounds = array<i64: 16, 66>}, {transform_indices = @transform_1, window_bounds = array<i64: 16, 66>}, {pipeline_mode = #tpu.pipeline_mode<synchronous>, transform_indices = @transform_2, window_bounds = array<i64: 2, 66, 32>}, {pipeline_mode = #tpu.pipeline_mode<synchronous>, transform_indices = @transform_3, window_bounds = array<i64: 2, 1, 32>}, {pipeline_mode = #tpu.pipeline_mode<synchronous>, transform_indices = @transform_4, window_bounds = array<i64: 32, 384>}, {pipeline_mode = #tpu.pipeline_mode<synchronous>, transform_indices = @transform_5, window_bounds = array<i64: 1, 384>}, {pipeline_mode = #tpu.pipeline_mode<synchronous>, transform_indices = @transform_6, window_bounds = array<i64: 128, 32>}, {pipeline_mode = #tpu.pipeline_mode<synchronous>, transform_indices = @transform_7, window_bounds = array<i64: 1, 32>}, {pipeline_mode = #tpu.pipeline_mode<synchronous>, transform_indices = @transform_8, window_bounds = array<i64: 2, 32, 64>}, {pipeline_mode = #tpu.pipeline_mode<synchronous>, transform_indices = @transform_9, window_bounds = array<i64: 1, 64>}, {pipeline_mode = #tpu.pipeline_mode<synchronous>, transform_indices = @transform_10, window_bounds = array<i64: 64, 128>}, {pipeline_mode = #tpu.pipeline_mode<synchronous>, transform_indices = @transform_11, window_bounds = array<i64: 1, 128>}, {transform_indices = @transform_12, window_bounds = array<i64: 16, 2>}]} {
    %c0 = arith.constant 0 : index
    %c0_0 = arith.constant 0 : index
    %0 = vector.load %arg1[%c0, %c0_0] : memref<16x66xbf16, #tpu.memory_space<vmem>>, vector<16x66xbf16>
    %c0_1 = arith.constant 0 : index
    %c0_2 = arith.constant 0 : index
    %c0_3 = arith.constant 0 : index
    %1 = vector.load %arg3[%c0_1, %c0_2, %c0_3] : memref<2x66x32xbf16, #tpu.memory_space<vmem>>, vector<1x66x32xbf16>
    %2 = vector.shape_cast %1 : vector<1x66x32xbf16> to vector<66x32xbf16>
    %cst = arith.constant dense<0.000000e+00> : vector<16x32xf32>
    %3 = tpu.matmul %0, %2, %cst {dimension_numbers = #tpu.dot_dimension_numbers<[1], [0], [0], [1], [0, 0, 1, 1], [], []>} : vector<16x66xbf16>, vector<66x32xbf16>, vector<16x32xf32> -> vector<16x32xf32>
    %c0_4 = arith.constant 0 : index
    %c0_5 = arith.constant 0 : index
    %c0_6 = arith.constant 0 : index
    %4 = vector.load %arg4[%c0_4, %c0_5, %c0_6] : memref<2x1x32xf32, #tpu.memory_space<vmem>>, vector<1x1x32xf32>
    %5 = vector.shape_cast %4 : vector<1x1x32xf32> to vector<1x32xf32>
    %6 = vector.broadcast %5 : vector<1x32xf32> to vector<16x32xf32>
    %7 = arith.addf %3, %6 : vector<16x32xf32>
    %cst_7 = arith.constant 0.000000e+00 : f32
    %8 = vector.broadcast %cst_7 : f32 to vector<16x32xf32>
    %9 = arith.cmpf oge, %7, %8 : vector<16x32xf32>
    %cst_8 = arith.constant 0.00999999977 : f32
    %10 = vector.broadcast %cst_8 : f32 to vector<16x32xf32>
    %11 = arith.mulf %10, %7 : vector<16x32xf32>
    %12 = arith.select %9, %7, %11 : vector<16x32xi1>, vector<16x32xf32>
    %c0_9 = arith.constant 0 : index
    %c0_10 = arith.constant 0 : index
    %13 = vector.load %arg2[%c0_9, %c0_10] : memref<16x66xbf16, #tpu.memory_space<vmem>>, vector<16x66xbf16>
    %c1 = arith.constant 1 : index
    %c0_11 = arith.constant 0 : index
    %c0_12 = arith.constant 0 : index
    %14 = vector.load %arg3[%c1, %c0_11, %c0_12] : memref<2x66x32xbf16, #tpu.memory_space<vmem>>, vector<1x66x32xbf16>
    %15 = vector.shape_cast %14 : vector<1x66x32xbf16> to vector<66x32xbf16>
    %cst_13 = arith.constant dense<0.000000e+00> : vector<16x32xf32>
    %16 = tpu.matmul %13, %15, %cst_13 {dimension_numbers = #tpu.dot_dimension_numbers<[1], [0], [0], [1], [0, 0, 1, 1], [], []>} : vector<16x66xbf16>, vector<66x32xbf16>, vector<16x32xf32> -> vector<16x32xf32>
    %c1_14 = arith.constant 1 : index
    %c0_15 = arith.constant 0 : index
    %c0_16 = arith.constant 0 : index
    %17 = vector.load %arg4[%c1_14, %c0_15, %c0_16] : memref<2x1x32xf32, #tpu.memory_space<vmem>>, vector<1x1x32xf32>
    %18 = vector.shape_cast %17 : vector<1x1x32xf32> to vector<1x32xf32>
    %19 = vector.broadcast %18 : vector<1x32xf32> to vector<16x32xf32>
    %20 = arith.addf %16, %19 : vector<16x32xf32>
    %cst_17 = arith.constant 0.000000e+00 : f32
    %21 = vector.broadcast %cst_17 : f32 to vector<16x32xf32>
    %22 = arith.cmpf oge, %20, %21 : vector<16x32xf32>
    %cst_18 = arith.constant 0.00999999977 : f32
    %23 = vector.broadcast %cst_18 : f32 to vector<16x32xf32>
    %24 = arith.mulf %23, %20 : vector<16x32xf32>
    %25 = arith.select %22, %20, %24 : vector<16x32xi1>, vector<16x32xf32>
    %26 = tpu.concatenate %12, %25 in 0 : vector<16x32xf32>, vector<16x32xf32> -> vector<32x32xf32>
    %27 = arith.truncf %26 : vector<32x32xf32> to vector<32x32xbf16>
    %c0_19 = arith.constant 0 : index
    %c0_20 = arith.constant 0 : index
    %28 = vector.load %arg5[%c0_19, %c0_20] : memref<32x384xbf16, #tpu.memory_space<vmem>>, vector<32x384xbf16>
    %cst_21 = arith.constant dense<0.000000e+00> : vector<32x384xf32>
    %29 = tpu.matmul %27, %28, %cst_21 {dimension_numbers = #tpu.dot_dimension_numbers<[1], [0], [0], [1], [0, 0, 1, 1], [], []>} : vector<32x32xbf16>, vector<32x384xbf16>, vector<32x384xf32> -> vector<32x384xf32>
    %c0_22 = arith.constant 0 : index
    %c0_23 = arith.constant 0 : index
    %30 = vector.load %arg6[%c0_22, %c0_23] : memref<1x384xf32, #tpu.memory_space<vmem>>, vector<1x384xf32>
    %31 = vector.broadcast %30 : vector<1x384xf32> to vector<32x384xf32>
    %32 = arith.addf %29, %31 : vector<32x384xf32>
    %33 = vector.extract_strided_slice %32 {offsets = [0, 0], sizes = [32, 128], strides = [1, 1]} : vector<32x384xf32> to vector<32x128xf32>
    %34 = vector.extract_strided_slice %32 {offsets = [0, 128], sizes = [32, 128], strides = [1, 1]} : vector<32x384xf32> to vector<32x128xf32>
    %35 = vector.extract_strided_slice %32 {offsets = [0, 256], sizes = [32, 128], strides = [1, 1]} : vector<32x384xf32> to vector<32x128xf32>
    %c16_i32 = arith.constant 16 : i32
    %36 = tpu.dynamic_rotate %34 by %c16_i32 dim 0 : vector<32x128xf32>, i32 -> vector<32x128xf32>
    %c16_i32_24 = arith.constant 16 : i32
    %37 = tpu.dynamic_rotate %35 by %c16_i32_24 dim 0 : vector<32x128xf32>, i32 -> vector<32x128xf32>
    %cst_25 = arith.constant 3.200000e+01 : f32
    %38 = math.sqrt %cst_25 : f32
    %cst_26 = arith.constant 1.000000e+00 : f32
    %39 = arith.divf %cst_26, %38 : f32
    %40 = arith.mulf %33, %34 : vector<32x128xf32>
    %cst_27 = arith.constant dense<0.000000e+00> : vector<32xf32>
    %41 = vector.multi_reduction <add>, %40, %cst_27 [1] : vector<32x128xf32> to vector<32xf32>
    %42 = vector.shape_cast %41 : vector<32xf32> to vector<32x1xf32>
    %43 = vector.broadcast %39 : f32 to vector<32x1xf32>
    %44 = arith.mulf %42, %43 : vector<32x1xf32>
    %45 = arith.mulf %33, %36 : vector<32x128xf32>
    %cst_28 = arith.constant dense<0.000000e+00> : vector<32xf32>
    %46 = vector.multi_reduction <add>, %45, %cst_28 [1] : vector<32x128xf32> to vector<32xf32>
    %47 = vector.shape_cast %46 : vector<32xf32> to vector<32x1xf32>
    %48 = vector.broadcast %39 : f32 to vector<32x1xf32>
    %49 = arith.mulf %47, %48 : vector<32x1xf32>
    %50 = arith.maximumf %44, %49 : vector<32x1xf32>
    %51 = arith.subf %44, %50 : vector<32x1xf32>
    %52 = math.exp %51 : vector<32x1xf32>
    %53 = arith.subf %49, %50 : vector<32x1xf32>
    %54 = math.exp %53 : vector<32x1xf32>
    %55 = arith.addf %52, %54 : vector<32x1xf32>
    %56 = tpu.reciprocal %55 {approx = true} : vector<32x1xf32> -> vector<32x1xf32>
    %57 = arith.mulf %52, %56 : vector<32x1xf32>
    %58 = vector.broadcast %57 : vector<32x1xf32> to vector<32x128xf32>
    %59 = arith.mulf %58, %35 : vector<32x128xf32>
    %60 = arith.mulf %54, %56 : vector<32x1xf32>
    %61 = vector.broadcast %60 : vector<32x1xf32> to vector<32x128xf32>
    %62 = arith.mulf %61, %37 : vector<32x128xf32>
    %63 = arith.addf %59, %62 : vector<32x128xf32>
    %64 = arith.truncf %63 : vector<32x128xf32> to vector<32x128xbf16>
    %c0_29 = arith.constant 0 : index
    %c0_30 = arith.constant 0 : index
    %65 = vector.load %arg7[%c0_29, %c0_30] : memref<128x32xbf16, #tpu.memory_space<vmem>>, vector<128x32xbf16>
    %cst_31 = arith.constant dense<0.000000e+00> : vector<32x32xf32>
    %66 = tpu.matmul %64, %65, %cst_31 {dimension_numbers = #tpu.dot_dimension_numbers<[1], [0], [0], [1], [0, 0, 1, 1], [], []>} : vector<32x128xbf16>, vector<128x32xbf16>, vector<32x32xf32> -> vector<32x32xf32>
    %67 = arith.addf %26, %66 : vector<32x32xf32>
    %c0_32 = arith.constant 0 : index
    %c0_33 = arith.constant 0 : index
    %68 = vector.load %arg8[%c0_32, %c0_33] : memref<1x32xf32, #tpu.memory_space<vmem>>, vector<1x32xf32>
    %69 = vector.broadcast %68 : vector<1x32xf32> to vector<32x32xf32>
    %70 = arith.addf %67, %69 : vector<32x32xf32>
    %71 = vector.extract_strided_slice %70 {offsets = [0, 0], sizes = [16, 32], strides = [1, 1]} : vector<32x32xf32> to vector<16x32xf32>
    %72 = vector.extract_strided_slice %70 {offsets = [16, 0], sizes = [16, 32], strides = [1, 1]} : vector<32x32xf32> to vector<16x32xf32>
    %73 = arith.truncf %71 : vector<16x32xf32> to vector<16x32xbf16>
    %c0_34 = arith.constant 0 : index
    %c0_35 = arith.constant 0 : index
    %c0_36 = arith.constant 0 : index
    %74 = vector.load %arg9[%c0_34, %c0_35, %c0_36] : memref<2x32x64xbf16, #tpu.memory_space<vmem>>, vector<1x32x64xbf16>
    %75 = vector.shape_cast %74 : vector<1x32x64xbf16> to vector<32x64xbf16>
    %cst_37 = arith.constant dense<0.000000e+00> : vector<16x64xf32>
    %76 = tpu.matmul %73, %75, %cst_37 {dimension_numbers = #tpu.dot_dimension_numbers<[1], [0], [0], [1], [0, 0, 1, 1], [], []>} : vector<16x32xbf16>, vector<32x64xbf16>, vector<16x64xf32> -> vector<16x64xf32>
    %77 = arith.truncf %72 : vector<16x32xf32> to vector<16x32xbf16>
    %c1_38 = arith.constant 1 : index
    %c0_39 = arith.constant 0 : index
    %c0_40 = arith.constant 0 : index
    %78 = vector.load %arg9[%c1_38, %c0_39, %c0_40] : memref<2x32x64xbf16, #tpu.memory_space<vmem>>, vector<1x32x64xbf16>
    %79 = vector.shape_cast %78 : vector<1x32x64xbf16> to vector<32x64xbf16>
    %cst_41 = arith.constant dense<0.000000e+00> : vector<16x64xf32>
    %80 = tpu.matmul %77, %79, %cst_41 {dimension_numbers = #tpu.dot_dimension_numbers<[1], [0], [0], [1], [0, 0, 1, 1], [], []>} : vector<16x32xbf16>, vector<32x64xbf16>, vector<16x64xf32> -> vector<16x64xf32>
    %81 = arith.addf %76, %80 : vector<16x64xf32>
    %c0_42 = arith.constant 0 : index
    %c0_43 = arith.constant 0 : index
    %82 = vector.load %arg10[%c0_42, %c0_43] : memref<1x64xf32, #tpu.memory_space<vmem>>, vector<1x64xf32>
    %83 = vector.broadcast %82 : vector<1x64xf32> to vector<16x64xf32>
    %84 = arith.addf %81, %83 : vector<16x64xf32>
    %cst_44 = arith.constant 0.000000e+00 : f32
    %85 = vector.broadcast %cst_44 : f32 to vector<16x64xf32>
    %86 = arith.maximumf %84, %85 : vector<16x64xf32>
    %87 = arith.truncf %86 : vector<16x64xf32> to vector<16x64xbf16>
    %c0_45 = arith.constant 0 : index
    %c0_46 = arith.constant 0 : index
    %88 = vector.load %arg11[%c0_45, %c0_46] : memref<64x128xbf16, #tpu.memory_space<vmem>>, vector<64x128xbf16>
    %cst_47 = arith.constant dense<0.000000e+00> : vector<16x128xf32>
    %89 = tpu.matmul %87, %88, %cst_47 {dimension_numbers = #tpu.dot_dimension_numbers<[1], [0], [0], [1], [0, 0, 1, 1], [], []>} : vector<16x64xbf16>, vector<64x128xbf16>, vector<16x128xf32> -> vector<16x128xf32>
    %c0_48 = arith.constant 0 : index
    %c0_49 = arith.constant 0 : index
    %90 = vector.load %arg12[%c0_48, %c0_49] : memref<1x128xf32, #tpu.memory_space<vmem>>, vector<1x128xf32>
    %91 = vector.broadcast %90 : vector<1x128xf32> to vector<16x128xf32>
    %92 = arith.addf %89, %91 : vector<16x128xf32>
    %93 = vector.extract_strided_slice %92 {offsets = [0, 0], sizes = [16, 2], strides = [1, 1]} : vector<16x128xf32> to vector<16x2xf32>
    %c0_50 = arith.constant 0 : index
    %c0_51 = arith.constant 0 : index
    %94 = vector.load %arg13[%c0_50, %c0_51] : memref<16x2xf32, #tpu.memory_space<vmem>>, vector<16x2xf32>
    tpu.vector_store %arg13[%c0_50, %c0_51], %93 {strides = array<i32>} : memref<16x2xf32, #tpu.memory_space<vmem>>, vector<16x2xf32>,
    return
  }
  func.func @transform_0(%arg0: i32) -> (i32, i32) {
    %c0_i32 = arith.constant 0 : i32
    %c0_i32_0 = arith.constant 0 : i32
    return %arg0, %c0_i32 : i32, i32
  }
  func.func @transform_1(%arg0: i32) -> (i32, i32) {
    %c0_i32 = arith.constant 0 : i32
    %c0_i32_0 = arith.constant 0 : i32
    return %arg0, %c0_i32 : i32, i32
  }
  func.func @transform_2(%arg0: i32) -> (i32, i32, i32) {
    %c0_i32 = arith.constant 0 : i32
    %c0_i32_0 = arith.constant 0 : i32
    %c0_i32_1 = arith.constant 0 : i32
    %c0_i32_2 = arith.constant 0 : i32
    return %c0_i32, %c0_i32_0, %c0_i32_1 : i32, i32, i32
  }
  func.func @transform_3(%arg0: i32) -> (i32, i32, i32) {
    %c0_i32 = arith.constant 0 : i32
    %c0_i32_0 = arith.constant 0 : i32
    %c0_i32_1 = arith.constant 0 : i32
    %c0_i32_2 = arith.constant 0 : i32
    return %c0_i32, %c0_i32_0, %c0_i32_1 : i32, i32, i32
  }
  func.func @transform_4(%arg0: i32) -> (i32, i32) {
    %c0_i32 = arith.constant 0 : i32
    %c0_i32_0 = arith.constant 0 : i32
    %c0_i32_1 = arith.constant 0 : i32
    return %c0_i32, %c0_i32_0 : i32, i32
  }
  func.func @transform_5(%arg0: i32) -> (i32, i32) {
    %c0_i32 = arith.constant 0 : i32
    %c0_i32_0 = arith.constant 0 : i32
    %c0_i32_1 = arith.constant 0 : i32
    return %c0_i32, %c0_i32_0 : i32, i32
  }
  func.func @transform_6(%arg0: i32) -> (i32, i32) {
    %c0_i32 = arith.constant 0 : i32
    %c0_i32_0 = arith.constant 0 : i32
    %c0_i32_1 = arith.constant 0 : i32
    return %c0_i32, %c0_i32_0 : i32, i32
  }
  func.func @transform_7(%arg0: i32) -> (i32, i32) {
    %c0_i32 = arith.constant 0 : i32
    %c0_i32_0 = arith.constant 0 : i32
    %c0_i32_1 = arith.constant 0 : i32
    return %c0_i32, %c0_i32_0 : i32, i32
  }
  func.func @transform_8(%arg0: i32) -> (i32, i32, i32) {
    %c0_i32 = arith.constant 0 : i32
    %c0_i32_0 = arith.constant 0 : i32
    %c0_i32_1 = arith.constant 0 : i32
    %c0_i32_2 = arith.constant 0 : i32
    return %c0_i32, %c0_i32_0, %c0_i32_1 : i32, i32, i32
  }
  func.func @transform_9(%arg0: i32) -> (i32, i32) {
    %c0_i32 = arith.constant 0 : i32
    %c0_i32_0 = arith.constant 0 : i32
    %c0_i32_1 = arith.constant 0 : i32
    return %c0_i32, %c0_i32_0 : i32, i32
  }
  func.func @transform_10(%arg0: i32) -> (i32, i32) {
    %c0_i32 = arith.constant 0 : i32
    %c0_i32_0 = arith.constant 0 : i32
    %c0_i32_1 = arith.constant 0 : i32
    return %c0_i32, %c0_i32_0 : i32, i32
  }
  func.func @transform_11(%arg0: i32) -> (i32, i32) {
    %c0_i32 = arith.constant 0 : i32
    %c0_i32_0 = arith.constant 0 : i32
    %c0_i32_1 = arith.constant 0 : i32
    return %c0_i32, %c0_i32_0 : i32, i32
  }
  func.func @transform_12(%arg0: i32) -> (i32, i32) {
    %c0_i32 = arith.constant 0 : i32
    %c0_i32_0 = arith.constant 0 : i32
    return %arg0, %c0_i32 : i32, i32
  }
}

</mosaic_0001>

<bundles_post_ra>
// kernel: tpu_custom_call.1
= control target key start
LH: loop header
LB: loop body
LE: loop exit
PB: predicated region body
PF: predicated region fallthrough
CT: control target
= control target key end

     0   :  { %s1669_s21 = smov 0   ;;  %s1867_s0 = inlined_call_operand.vmem [shape: bf16[32,66], index: 0, kind: input, shape index: {}]   ;;  %s1868_s1 = inlined_call_operand.vmem [shape: bf16[32,66], index: 1, kind: input, shape index: {}]   ;;  %s1869_s2 = inlined_call_operand.vmem [shape: bf16[2,66,32], index: 2, kind: input, shape index: {}]   ;;  %s1870_s3 = inlined_call_operand.vmem [shape: f32[2,1,32], index: 3, kind: input, shape index: {}]   ;;  %s1871_s4 = inlined_call_operand.vmem [shape: bf16[32,384], index: 4, kind: input, shape index: {}]   ;;  %s1872_s5 = inlined_call_operand.vmem [shape: f32[1,384], index: 5, kind: input, shape index: {}]   ;;  %s1873_s6 = inlined_call_operand.vmem [shape: bf16[128,32], index: 6, kind: input, shape index: {}]   ;;  %s1874_s7 = inlined_call_operand.vmem [shape: f32[1,32], index: 7, kind: input, shape index: {}]   ;;  %s1875_s8 = inlined_call_operand.vmem [shape: bf16[2,32,64], index: 8, kind: input, shape index: {}]   ;;  %s1876_s9 = inlined_call_operand.vmem [shape: f32[1,64], index: 9, kind: input, shape index: {}]   ;;  %s1877_s10 = inlined_call_operand.vmem [shape: bf16[64,128], index: 10, kind: input, shape index: {}]   ;;  %s1878_s11 = inlined_call_operand.vmem [shape: f32[1,128], index: 11, kind: input, shape index: {}]   ;;  %s1879_s12 = inlined_call_operand.vmem [shape: f32[32,2], index: 12, kind: output, shape index: {}]  }
   0x1 LB: > { %s1326_s22 = sadd.s32 4294967295, %s1599_s21   ;;  %p1330_p0 = scmp.ge.s32.totalorder %s1599_s21, 1  ;;  %s1599_s21 = sphi %s1669_s21, %s22_s21  }
   0x2   : > { %p374_p1 = scmp.lt.s32.totalorder %s1599_s21, 3 }
   0x4   : > { %p375_p2 = pnand %p1330_p0, %p374_p1 }
   0x5   : > { %s1331_s13 = sshll.u32 (!%p375_p2), %s1326_s22, 1 }
   0x6   : > { %378 = sbr.rel (%p375_p2) target bundleno = 1256 (0x4e8), region = 68  ;;  %p422_p3 = scmp.lt.s32.totalorder (!%p375_p2), %s1331_s13, 3 }
   0xb   : > { %v1533_v0 = vld [vmem:[%s1869_s2 + $0x20] ss:$0 sps:$4 sm:$0x11]   ;;  %v1601_v1 = vmov 0.0   ;;  %vm494_vm0 = vcmask 1040384   ;;  %v1535_v5 = vld [vmem:[%s1869_s2 + $0x18] sm:$0xff]   ;;  %v662_v46 = vlaneseq }
   0xc   : > { %1438 = vmatprep.subr.bf16.mxu0 %v1601_v1  ;;  %1452 = vmatprep.subr.bf16.mxu1 %v1601_v1  ;;  %v1534_v2 = vld [vmem:[%s1869_s2 + $0x44] ss:$0 sps:$4 sm:$0x11]   ;;  %v496_v3 = vsel %vm494_vm0, %v1533_v0, 0  ;;  %v1536_v6 = vld [vmem:[%s1869_s2 + $0x3c] sm:$0xff]   ;;  %vm1602_vm1 = vmmov 0  }
   0xd   : > { %1439 = vmatpush3.bf16.msra.mxu0 %v496_v3  ;;  %v601_v4 = vsel %vm494_vm0, %v1534_v2, 0  ;;  %1448 = vmatprep.mubr.msk.bf16.mxu0 %vm1602_vm1, %v1601_v1  ;;  %v1537_v7 = vld [vmem:[%s1869_s2 + $0x10] sm:$0xff]   ;;  %s1881_s13 = smov (!%p422_p3, %s1331_s13), 3  ;;  %v1539_v9 = vld [vmem:[%s1869_s2 + $0x8] sm:$0xff]   ;;  %v1541_v11 = vld [vmem:[%s1869_s2] sm:$0xff]   ;;  %vm490_vm2 = vcmask 539648  }
   0xe   : > { %1453 = vmatpush3.bf16.msra.mxu1 %v601_v4  ;;  %1440 = vmatprep.subr.bf16.mxu0 %v1601_v1  ;;  %v1538_v8 = vld [vmem:[%s1869_s2 + $0x34] sm:$0xff]   ;;  %s1332_s20 = sshll.u32 %s1881_s13, 2  ;;  %v1540_v10 = vld [vmem:[%s1869_s2 + $0x2c] sm:$0xff]   ;;  %v1542_v12 = vld [vmem:[%s1869_s2 + $0x24] sm:$0xff]   ;;  %v1603_v21 = vmov 0   ;;  %vm709_vm7 = vcmask 261120  }
   0xf   : > { %1454 = vmatprep.subr.bf16.mxu1 %v1601_v1  ;;  %1462 = vmatprep.mubr.msk.bf16.mxu1 %vm1602_vm1, %v1601_v1  ;;  %s425_s24 = scalar_lea.vmem %s1867_s0, %s1332_s20  ;;  %s431_s29 = scalar_lea.vmem %s1868_s1, %s1332_s20  ;;  %v1547_v15 = vld [vmem:[%s1871_s4 + $0x1c] ss:$12 sps:$4 sm:$0xff]   ;;  %v1545_v16 = vld [vmem:[%s1871_s4 + $0x18] ss:$12 sps:$4 sm:$0xff]   ;;  %v1548_v17 = vld [vmem:[%s1871_s4 + $0x20] ss:$12 sps:$4 sm:$0xff]  }
  0x10   : > { %v1543_v13 = vld [vmem:[%s425_s24] sm:$0xff]   ;;  %v1552_v20 = vld [vmem:[%s1871_s4 + $0x8] ss:$12 sps:$4 sm:$0xff]   ;;  %v1773_v47 = vshrl.u32 %v662_v46, 7  ;;  %vm1210_vm8 = vcmask 523264   ;;  %s1336_s24 = sshll.u32 %s1881_s13, 3 }
  0x11   : > { %1441 = vmatpush3.bf16.msra.mxu0 %v1535_v5  ;;  %v1544_v14 = vld [vmem:[%s431_s29] sm:$0xff]   ;;  %s437_s29 = scalar_lea.vmem %s1879_s12, %s1336_s24  ;;  %vm1255_vm9 = vcmask 15360  }
  0x12   : > { %1455 = vmatpush3.bf16.msra.mxu1 %v1536_v6  ;;  %1442 = vmatprep.subr.bf16.mxu0 %v1601_v1  ;;  %v1551_v18 = vld [vmem:[%s1871_s4 + $0x4] ss:$12 sps:$4 sm:$0xff]   ;;  %v1549_v19 = vld [vmem:[%s1871_s4] ss:$12 sps:$4 sm:$0xff]   ;;  %v664_v48 = vsub.s32 0, %v1773_v47  ;;  %v668_v49 = vsub.s32 1, %v1773_v47 }
  0x13   : > { %1456 = vmatprep.subr.bf16.mxu1 %v1601_v1  ;;  %v1337_v22 = vld [vmem:[%s1870_s3] ss:$0 sm:$0xff]  ;;  %v1355_v23 = vld [vmem:[%s1870_s3 + $0x1] ss:$0 sm:$0xff] }
  0x14   : > { %v1780_v50 = vld [vmem:[%s1872_s5] sm:$0x7] }
  0x15   : > { %1443 = vmatpush3.bf16.msra.mxu0 %v1537_v7  ;;  %v665_v51 = vrot.slane %v1780_v50, %v664_v48  ;;  %v669_v52 = vrot.slane %v1780_v50, %v668_v49 }
  0x16   : > { %1457 = vmatpush3.bf16.msra.mxu1 %v1538_v8  ;;  %1444 = vmatprep.subr.bf16.mxu0 %v1601_v1 }
  0x17   : > { %1458 = vmatprep.subr.bf16.mxu1 %v1601_v1 }
  0x19   : > { %1445 = vmatpush3.bf16.msra.mxu0 %v1539_v9 }
  0x1a   : > { %1459 = vmatpush3.bf16.msra.mxu1 %v1540_v10  ;;  %1446 = vmatprep.subr.bf16.mxu0 %v1601_v1 }
  0x1b   : > { %1460 = vmatprep.subr.bf16.mxu1 %v1601_v1 }
  0x1d   : > { %1447 = vmatpush3.bf16.msra.mxu0 %v1541_v11 }
  0x1e   : > { %1461 = vmatpush3.bf16.msra.mxu1 %v1542_v12  ;;  %728 = vmatprep.subr.bf16.mxu0 %v1547_v15  ;;  %v1554_v15 = vld [vmem:[%s1873_s6 + $0x30] sm:$0xff]  }
  0x1f   : > { %1466 = vmatprep.subr.bf16.mxu1 %v1548_v17 }
  0x20   : > { %1449 = vmatmul.mubr.msk.bf16.vlgmr.msra.gmra.mxu0 %vm490_vm2, %v1543_v13 }
  0x21   : > { %1463 = vmatmul.mubr.msk.bf16.vlgmr.msra.gmra.mxu1 %vm490_vm2, %v1544_v14  ;;  %729 = vmatpush1.bf16.msra.mxu0 %v1545_v16  ;;  %v1553_v14 = vld [vmem:[%s1873_s6 + $0x38] sm:$0xff]   ;;  %v1555_v16 = vld [vmem:[%s1873_s6 + $0x28] sm:$0xff]  }
  0x22   : > { %1467 = vmatpush3.bf16.msra.mxu1 %v1548_v17  ;;  %730 = vmatprep.subr.bf16.mxu0 %v1551_v18  ;;  %v1556_v17 = vld [vmem:[%s1873_s6 + $0x20] sm:$0xff]   ;;  %v1557_v18 = vld [vmem:[%s1873_s6 + $0x18] sm:$0xff]  }
  0x23   : > { %1468 = vmatprep.subr.bf16.mxu1 %v1552_v20  ;;  %748 = vmatprep.mubr.bf16.mxu0 %v1603_v21 }
  0x25   : > { %731 = vmatpush1.bf16.msra.mxu0 %v1549_v19  ;;  %v1558_v19 = vld [vmem:[%s1873_s6 + $0x10] sm:$0xff]  }
  0x26   : > { %1469 = vmatpush3.bf16.msra.mxu1 %v1552_v20  ;;  %1474 = vmatprep.subr.bf16.mxu0 %v1553_v14  ;;  %v1559_v20 = vld [vmem:[%s1873_s6 + $0x8] sm:$0xff]  }
  0x27   : > { %1494 = vmatprep.subr.bf16.mxu1 %v1601_v1 }
  0xe0   : > { %v532_v24 = vpop.f32.mrf.mxu0 }
  0xe1   : > { %v533_v25 = vadd.f32 %v1337_v22, %v532_v24  ;;  %v637_v26 = vpop.f32.mrf.mxu1 }
  0xe2   : > { %v638_v27 = vadd.f32 %v1355_v23, %v637_v26  ;;  %v1450_v28 = vpop.f32.mrf.mxu0 }
  0xe3   : > { %v1464_v29 = vpop.f32.mrf.mxu1  ;;  %v541_v32 = vmul.f32 0.01, %v533_v25  ;;  %vm539_vm4 = vcmp.ge.f32.partialorder %v533_v25, 0.0 }
  0xe4   : > { %v646_v30 = vmul.f32 0.01, %v638_v27  ;;  %v535_v31 = vpop.f32.mrf.mxu0  ;;  %vm644_vm3 = vcmp.ge.f32.partialorder %v638_v27, 0.0 }
  0xe5   : > { %v536_v33 = vadd.f32 %v1337_v22, %v535_v31  ;;  %v640_v34 = vpop.f32.mrf.mxu1  ;;  %v1757_v41 = vsel %vm539_vm4, %v533_v25, %v541_v32 }
  0xe6   : > { %v641_v35 = vadd.f32 %v1355_v23, %v640_v34  ;;  %v1451_v36 = vpop.f32.mrf.mxu0  ;;  %v1755_v39 = vsel %vm644_vm3, %v638_v27, %v646_v30 }
  0xe7   : > { %vm540_vm5 = vcmp.ge.f32.partialorder %v536_v33, 0.0  ;;  %v542_v37 = vmul.f32 0.01, %v536_v33  ;;  %v1465_v38 = vpop.f32.mrf.mxu1 }
  0xe8   : > { %vm645_vm6 = vcmp.ge.f32.partialorder %v641_v35, 0.0  ;;  %v647_v40 = vmul.f32 0.01, %v641_v35 }
  0xe9   : > { %v1759_v42 = vsel %vm540_vm5, %v536_v33, %v542_v37 }
  0xea   : > { %v650_v43 = vpack.c.bf16 %v1759_v42, %v1757_v41  ;;  %v1763_v44 = vsel %vm645_vm6, %v641_v35, %v647_v40 }
  0xeb   : > { %v651_v45 = vpack.c.bf16 %v1763_v44, %v1755_v39 }
  0xec   : > { %1369 = vmatmul.mubr.msk.bf16.vlgmr.msra.gmra.mxu0 %vm709_vm7, %v650_v43  ;;  %1470 = vmatprep.mubr.msk.bf16.mxu1 %vm709_vm7, %v650_v43 }
  0xed   : > { %1471 = vmatmul.mubr.msk.bf16.vlgmr.msra.gmra.mxu1 %vm709_vm7, %v651_v45  ;;  %758 = vmatprep.mubr.bf16.mxu0 %v1603_v21  ;;  %v1560_v21 = vld [vmem:[%s1873_s6] sm:$0xff]  }
  0xee   : > { %1498 = vmatprep.mubr.msk.bf16.mxu1 %vm1602_vm1, %v1601_v1  ;;  %1475 = vmatpush3.bf16.msra.mxu0 %v1553_v14 }
  0xef   : > { %1476 = vmatprep.subr.bf16.mxu0 %v1554_v15 }
  0xf2   : > { %1477 = vmatpush3.bf16.msra.mxu0 %v1554_v15 }
  0xf3   : > { %1478 = vmatprep.subr.bf16.mxu0 %v1555_v16 }
  0xf4   : > { %1370 = vmatmul.mubr.msk.bf16.gmra.mxu0 %vm709_vm7, %v651_v45 }
  0xf6   : > { %1479 = vmatpush3.bf16.msra.mxu0 %v1555_v16 }
  0xf7   : > { %1480 = vmatprep.subr.bf16.mxu0 %v1556_v17 }
  0xfa   : > { %1481 = vmatpush3.bf16.msra.mxu0 %v1556_v17 }
  0xfb   : > { %1482 = vmatprep.subr.bf16.mxu0 %v1557_v18 }
  0xfe   : > { %1483 = vmatpush3.bf16.msra.mxu0 %v1557_v18 }
  0xff   : > { %1484 = vmatprep.subr.bf16.mxu0 %v1558_v19 }
 0x102   : > { %1485 = vmatpush3.bf16.msra.mxu0 %v1558_v19 }
 0x103   : > { %1486 = vmatprep.subr.bf16.mxu0 %v1559_v20 }
 0x106   : > { %1487 = vmatpush3.bf16.msra.mxu0 %v1559_v20 }
 0x107   : > { %1488 = vmatprep.subr.bf16.mxu0 %v1560_v21 }
 0x10a   : > { %1489 = vmatpush3.bf16.msra.mxu0 %v1560_v21 }
 0x1ac   : > { %v750_v53 = vpop.f32.mrf.mxu0 }
 0x1ad   : > { %v751_v55 = vadd.f32 %v750_v53, %v665_v51 }
 0x1ae   : > { %v752_v54 = vpop.f32.mrf.mxu0 }
 0x1af   : > { %v753_v56 = vadd.f32 %v752_v54, %v669_v52 }
 0x1b0   : > { %v754_v57 = vpop.f32.mrf.mxu0 }
 0x1b1   : > { %v818_v58 = vmul.f32 %v753_v56, %v751_v55  ;;  %v755_v60 = vadd.f32 %v754_v57, %v665_v51 }
 0x1b2   : > { %v756_v59 = vpop.f32.mrf.mxu0 }
 0x1b3   : > { %v757_v61 = vadd.f32 %v756_v59, %v669_v52  ;;  %822 = vadd.xlane.f32.xlu0 %v818_v58 }
 0x1b4   : > { %v760_v62 = vpop.f32.mrf.mxu0 }
 0x1b5   : > { %v819_v63 = vmul.f32 %v757_v61, %v755_v60  ;;  %v761_v2 = vadd.f32 %v760_v62, %v665_v51 }
 0x1b6   : > { %v762_v0 = vpop.f32.mrf.mxu0 }
 0x1b7   : > { %v763_v3 = vadd.f32 %v762_v0, %v669_v52  ;;  %824 = vadd.xlane.f32.xlu0 %v819_v63  ;;  %v836_v10 = vmul.f32 %v761_v2, %v753_v56 }
 0x1b8   : > { %v764_v4 = vpop.f32.mrf.mxu0 }
 0x1b9   : > { %v834_v5 = vmul.f32 %v763_v3, %v751_v55  ;;  %v820_v6 = vmul.f32 %v763_v3, %v761_v2  ;;  %v765_v11 = vadd.f32 %v764_v4, %v665_v51 }
 0x1ba   : > { %v766_v7 = vpop.f32.mrf.mxu0 }
 0x1bb   : > { %v767_v8 = vadd.f32 %v766_v7, %v669_v52  ;;  %838 = vadd.xlane.f32.xlu1 %v834_v5  ;;  %826 = vadd.xlane.f32.xlu0 %v820_v6  ;;  %v837_v13 = vmul.f32 %v765_v11, %v757_v61  ;;  %v1472_v7 = vpop.f32.mrf.mxu1 }
 0x1bd   : > { %v835_v9 = vmul.f32 %v767_v8, %v755_v60  ;;  %v821_v12 = vmul.f32 %v767_v8, %v765_v11  ;;  %v803_v11 = vpop.f32.mrf.mxu1 }
 0x1bf   : > { %840 = vadd.xlane.f32.xlu1 %v835_v9  ;;  %842 = vadd.xlane.f32.xlu0 %v836_v10  ;;  %v1473_v15 = vpop.f32.mrf.mxu1 }
 0x1c1   : > { %v806_v19 = vpop.f32.mrf.mxu1 }
 0x1c3   : > { %828 = vadd.xlane.f32.xlu1 %v821_v12 }
 0x1c7   : > { %844 = vadd.xlane.f32.xlu1 %v837_v13  ;;  %v672_v13 = vsub.s32 2, %v1773_v47 }
 0x1c9   : > { %v673_v17 = vrot.slane %v1780_v50, %v672_v13 }
 0x23c   : > { %v823_v22 = vpop.xlane.xlu0 %822 }
 0x23d   : > { %v830_v26 = vmul.f32 0.17677669, %v823_v22  ;;  %v812_v22 = vadd.f32 %v1472_v7, %v673_v17  ;;  %v1567_v7 = vld [vmem:[%s1877_s10 + $0x8] sm:$0xff]  }
 0x240   : > { %v825_v23 = vpop.xlane.xlu0 %824 }
 0x241   : > { %v831_v29 = vmul.f32 0.17677669, %v825_v23  ;;  %v804_v23 = vadd.f32 %v803_v11, %v673_v17 }
 0x244   : > { %v839_v24 = vpop.xlane.xlu1 %838  ;;  %v827_v25 = vpop.xlane.xlu0 %826 }
 0x245   : > { %v846_v27 = vmul.f32 0.17677669, %v839_v24  ;;  %v832_v30 = vmul.f32 0.17677669, %v827_v25  ;;  %v815_v25 = vadd.f32 %v1473_v15, %v673_v17  ;;  %v1392_v15 = vld [vmem:[%s1876_s9] ss:$0 sm:$0xff] }
 0x247   : > { %v850_v28 = vmax.f32 %v830_v26, %v846_v27 }
 0x248   : > { %v841_v31 = vpop.xlane.xlu1 %840  ;;  %v843_v32 = vpop.xlane.xlu0 %842 }
 0x249   : > { %v854_v33 = vsub.f32 %v830_v26, %v850_v28  ;;  %v866_v34 = vsub.f32 %v846_v27, %v850_v28  ;;  %v847_v35 = vmul.f32 0.17677669, %v841_v31  ;;  %v848_v36 = vmul.f32 0.17677669, %v843_v32 }
 0x24a   : > { %v807_v26 = vadd.f32 %v806_v19, %v673_v17 }
 0x24b   : > { %v858_v37 = vmul.f32 1.442695, %v854_v33  ;;  %v870_v38 = vmul.f32 1.442695, %v866_v34  ;;  %v851_v40 = vmax.f32 %v831_v29, %v847_v35  ;;  %v852_v43 = vmax.f32 %v832_v30, %v848_v36 }
 0x24c   : > { %v829_v45 = vpop.xlane.xlu1 %828 }
 0x24d   : > { %1569 = vpow2.f32 %v858_v37  ;;  %v855_v46 = vsub.f32 %v831_v29, %v851_v40  ;;  %v867_v48 = vsub.f32 %v847_v35, %v851_v40  ;;  %v856_v49 = vsub.f32 %v832_v30, %v852_v43 }
 0x24e   : > { %1571 = vpow2.f32 %v870_v38  ;;  %v868_v51 = vsub.f32 %v848_v36, %v852_v43  ;;  %v833_v57 = vmul.f32 0.17677669, %v829_v45 }
 0x24f   : > { %v860_v52 = vmul.f32 1.442695, %v855_v46  ;;  %v872_v53 = vmul.f32 1.442695, %v867_v48  ;;  %v862_v54 = vmul.f32 1.442695, %v856_v49 }
 0x250   : > { %v874_v55 = vmul.f32 1.442695, %v868_v51  ;;  %v845_v56 = vpop.xlane.xlu1 %844 }
 0x251   : > { %1573 = vpow2.f32 %v860_v52  ;;  %v849_v58 = vmul.f32 0.17677669, %v845_v56 }
 0x252   : > { %1575 = vpow2.f32 %v872_v53  ;;  %v1561_v53 = vld [vmem:[%s1875_s8 + $0x18] sm:$0xff]  }
 0x253   : > { %1577 = vpow2.f32 %v862_v54  ;;  %v853_v59 = vmax.f32 %v833_v57, %v849_v58  ;;  %1495 = vmatpush3.bf16.msra.mxu1 %v1561_v53  ;;  %v1562_v54 = vld [vmem:[%s1875_s8 + $0x10] sm:$0xff]  }
 0x254   : > { %1579 = vpow2.f32 %v874_v55  ;;  %1496 = vmatprep.subr.bf16.mxu1 %v1601_v1 }
 0x255   : > { %v857_v60 = vsub.f32 %v833_v57, %v853_v59  ;;  %v869_v61 = vsub.f32 %v849_v58, %v853_v59  ;;  %v1381_v58 = vld [vmem:[%s1874_s7] ss:$0 sm:$0xff] }
 0x257   : > { %v864_v62 = vmul.f32 1.442695, %v857_v60  ;;  %v876_v63 = vmul.f32 1.442695, %v869_v61  ;;  %1497 = vmatpush3.bf16.msra.mxu1 %v1562_v54 }
 0x258   : > { %1502 = vmatprep.subr.bf16.mxu1 %v1601_v1 }
 0x259   : > { %1581 = vpow2.f32 %v864_v62 }
 0x25a   : > { %v1570_v0 = vpop.eup %1569  ;;  %1583 = vpow2.f32 %v876_v63 }
 0x25b   : > { %v1572_v2 = vpop.eup %1571 }
 0x25c   : > { %v878_v3 = vadd.f32 %v1572_v2, %v1570_v0 }
 0x25e   : > { %v1574_v4 = vpop.eup %1573  ;;  %1585 = vrcp.f32 %v878_v3 }
 0x25f   : > { %v1576_v5 = vpop.eup %1575 }
 0x260   : > { %v1578_v6 = vpop.eup %1577  ;;  %v879_v8 = vadd.f32 %v1576_v5, %v1574_v4 }
 0x261   : > { %v1580_v9 = vpop.eup %1579 }
 0x262   : > { %1587 = vrcp.f32 %v879_v8  ;;  %v880_v10 = vadd.f32 %v1580_v9, %v1578_v6  ;;  %v1568_v8 = vld [vmem:[%s1877_s10] sm:$0xff]  }
 0x264   : > { %1589 = vrcp.f32 %v880_v10 }
 0x266   : > { %v1582_v12 = vpop.eup %1581 }
 0x267   : > { %v1584_v14 = vpop.eup %1583 }
 0x268   : > { %v881_v16 = vadd.f32 %v1584_v14, %v1582_v12 }
 0x26a   : > { %1591 = vrcp.f32 %v881_v16 }
 0x26b   : > { %v1586_v18 = vpop.eup %1585 }
 0x26c   : > { %v886_v20 = vmul.f32 %v1586_v18, %v1570_v0  ;;  %v894_v21 = vmul.f32 %v1586_v18, %v1572_v2  ;;  %v1563_v0 = vld [vmem:[%s1875_s8 + $0x8] sm:$0xff]  }
 0x26e   : > { %v890_v28 = vmul.f32 %v886_v20, %v804_v23  ;;  %v898_v30 = vmul.f32 %v894_v21, %v812_v22 }
 0x26f   : > { %v1588_v24 = vpop.eup %1587 }
 0x270   : > { %v887_v27 = vmul.f32 %v1588_v24, %v1574_v4  ;;  %v895_v29 = vmul.f32 %v1588_v24, %v1576_v5  ;;  %v902_v34 = vadd.f32 %v898_v30, %v890_v28  ;;  %v1393_v24 = vld [vmem:[%s1878_s11] ss:$0 sm:$0xff] }
 0x271   : > { %v1590_v47 = vpop.eup %1589 }
 0x272   : > { %v891_v31 = vmul.f32 %v887_v27, %v807_v26  ;;  %v899_v32 = vmul.f32 %v895_v29, %v815_v25  ;;  %v896_v33 = vmul.f32 %v1590_v47, %v1580_v9  ;;  %v888_v35 = vmul.f32 %v1590_v47, %v1578_v6 }
 0x274   : > { %v903_v50 = vadd.f32 %v899_v32, %v891_v31  ;;  %v892_v43 = vmul.f32 %v888_v35, %v812_v22  ;;  %v900_v45 = vmul.f32 %v896_v33, %v804_v23 }
 0x276   : > { %v906_v36 = vpack.c.bf16 %v903_v50, %v902_v34  ;;  %v904_v49 = vadd.f32 %v900_v45, %v892_v43 }
 0x277   : > { %v1592_v37 = vpop.eup %1591 }
 0x278   : > { %v897_v38 = vmul.f32 %v1592_v37, %v1584_v14  ;;  %1490 = vmatprep.mubr.bf16.mxu0 %v906_v36  ;;  %v889_v40 = vmul.f32 %v1592_v37, %v1582_v12 }
 0x27a   : > { %v893_v46 = vmul.f32 %v889_v40, %v815_v25  ;;  %v901_v48 = vmul.f32 %v897_v38, %v807_v26 }
 0x27c   : > { %v905_v51 = vadd.f32 %v901_v48, %v893_v46 }
 0x27e   : > { %v907_v52 = vpack.c.bf16 %v905_v51, %v904_v49 }
 0x280   : > { %1491 = vmatmul.mubr.bf16.vlgmr.msra.gmra.mxu0 %v907_v52 }
 0x340   : > { %v1492_v55 = vpop.f32.mrf.mxu0 }
 0x341   : > { %v1023_v57 = vadd.f32 %v1492_v55, %v1755_v39  ;;  %v1564_v39 = vld [vmem:[%s1875_s8] sm:$0xff]  }
 0x342   : > { %v1006_v56 = vpop.f32.mrf.mxu0 }
 0x343   : > { %v1034_v62 = vadd.f32 %v1381_v58, %v1023_v57  ;;  %v1021_v4 = vadd.f32 %v1006_v56, %v1757_v41  ;;  %v1565_v41 = vld [vmem:[%s1877_s10 + $0x18] sm:$0xff]  }
 0x344   : > { %v1493_v59 = vpop.f32.mrf.mxu0 }
 0x345   : > { %v1024_v60 = vadd.f32 %v1493_v59, %v1763_v44  ;;  %v1032_v5 = vadd.f32 %v1381_v58, %v1021_v4 }
 0x346   : > { %v1009_v61 = vpop.f32.mrf.mxu0 }
 0x347   : > { %v1035_v63 = vadd.f32 %v1381_v58, %v1024_v60  ;;  %v1022_v3 = vadd.f32 %v1009_v61, %v1759_v42  ;;  %v1566_v42 = vld [vmem:[%s1877_s10 + $0x10] sm:$0xff]  }
 0x349   : > { %v1041_v2 = vpack.c.bf16 %v1035_v63, %v1034_v62  ;;  %v1033_v44 = vadd.f32 %v1381_v58, %v1022_v3 }
 0x34b   : > { %1499 = vmatmul.mubr.msk.bf16.vlgmr.msra.gmra.mxu1 %vm709_vm7, %v1041_v2  ;;  %v1036_v6 = vpack.c.bf16 %v1033_v44, %v1032_v5 }
 0x34c   : > { %1503 = vmatpush3.bf16.msra.mxu1 %v1563_v0  ;;  %1506 = vmatprep.mubr.msk.bf16.mxu1 %vm1602_vm1, %v1601_v1 }
 0x34d   : > { %1504 = vmatprep.subr.bf16.mxu1 %v1601_v1 }
 0x350   : > { %1505 = vmatpush3.bf16.msra.mxu1 %v1564_v39 }
 0x351   : > { %1510 = vmatprep.subr.bf16.mxu1 %v1601_v1 }
 0x353   : > { %1507 = vmatmul.mubr.msk.bf16.vlgmr.msra.gmra.mxu1 %vm709_vm7, %v1036_v6 }
 0x354   : > { %1518 = vmatprep.mubr.msk.bf16.mxu1 %vm1602_vm1, %v1601_v1  ;;  %1511 = vmatpush3.bf16.msra.mxu1 %v1565_v41 }
 0x355   : > { %1512 = vmatprep.subr.bf16.mxu1 %v1601_v1 }
 0x358   : > { %1513 = vmatpush3.bf16.msra.mxu1 %v1566_v42 }
 0x359   : > { %1514 = vmatprep.subr.bf16.mxu1 %v1601_v1 }
 0x35c   : > { %1515 = vmatpush3.bf16.msra.mxu1 %v1567_v7 }
 0x35d   : > { %1516 = vmatprep.subr.bf16.mxu1 %v1601_v1 }
 0x360   : > { %1517 = vmatpush3.bf16.msra.mxu1 %v1568_v8 }
 0x40b   : > { %v1096_v9 = vpop.f32.mrf.mxu1 }
 0x40d   : > { %v1500_v10 = vpop.f32.mrf.mxu1 }
 0x40f   : > { %v1099_v11 = vpop.f32.mrf.mxu1 }
 0x411   : > { %v1501_v12 = vpop.f32.mrf.mxu1 }
 0x413   : > { %v1152_v13 = vpop.f32.mrf.mxu1 }
 0x414   : > { %v1153_v14 = vadd.f32 %v1152_v13, %v1096_v9 }
 0x415   : > { %v1508_v16 = vpop.f32.mrf.mxu1 }
 0x416   : > { %v1166_v18 = vadd.f32 %v1392_v15, %v1153_v14 }
 0x417   : > { %v1155_v17 = vpop.f32.mrf.mxu1 }
 0x418   : > { %v1156_v1 = vadd.f32 %v1155_v17, %v1099_v11  ;;  %v1168_v21 = vmax.f32 %v1166_v18, 0.0 }
 0x419   : > { %v1509_v19 = vpop.f32.mrf.mxu1 }
 0x41a   : > { %v1167_v20 = vadd.f32 %v1392_v15, %v1156_v1 }
 0x41c   : > { %v1169_v22 = vmax.f32 %v1167_v20, 0.0 }
 0x41e   : > { %v1170_v23 = vpack.c.bf16 %v1169_v22, %v1168_v21 }
 0x420   : > { %1519 = vmatmul.mubr.msk.bf16.vlgmr.msra.gmra.mxu1 %vm1210_vm8, %v1170_v23 }
 0x4e0   : > { %v1248_v25 = vpop.f32.mrf.mxu1 }
 0x4e1   : > { %v1249_v26 = vadd.f32 %v1393_v24, %v1248_v25 }
 0x4e2   : > { %v1520_v27 = vpop.f32.mrf.mxu1 }
 0x4e3   : > { %1256 = vst.msk [vmem:[%s437_s29] sm:$0xff] %vm1255_vm9, %v1249_v26 }
 0x4e4   : > { %v1251_v28 = vpop.f32.mrf.mxu1 }
 0x4e5   : > { %v1252_v29 = vadd.f32 %v1393_v24, %v1251_v28 }
 0x4e6   : > { %v1521_v30 = vpop.f32.mrf.mxu1 }
 0x4e7   : > { %1257 = vst.msk [vmem:[%s437_s29 + $0x8] sm:$0xff] %vm1255_vm9, %v1252_v29 }
 0x4e8 PF: > { %s22_s21 = sadd.s32 1, %s1599_s21  }
 0x4e9   : > { %p19_p4 = scmp.ge.s32.totalorder %s22_s21, 4  }
 0x4eb   :  { %21 = sbr.rel (!%p19_p4) target bundleno = 1 (0x1), region = 104 }

</bundles_post_ra>
